<compile_context>
chip_gen: v6e
topology: v6e:2x2x1
jax: 0.10.0
libtpu: 0.0.40
codegen_flags: <defaults>
</compile_context>

<pallas_src>
import functools

import jax
import jax.numpy as jnp
from jax.experimental import pallas as pl
from jax.experimental.pallas import tpu as pltpu


def cnn_kernel(x_ref, w1_ref, b1_ref, w23_ref, b23_ref, o_ref):
    # x_ref:   (C_in,  TILE_N)  batch on the 128-wide lane axis (compute dtype)
    # w1_ref:  (C_out, C_in)    conv weight, kernel_size=1 (compute dtype)
    # b1_ref:  (C_out, 1)       f32
    # w23_ref: (C_out, 1)       f32 column = (fc2_w @ fc1_w).T  (folded linears)
    # b23_ref: (1, 1)           f32 scalar = fc2_w @ fc1_b + fc2_b
    # o_ref:   (1, TILE_N)      f32
    h = jnp.dot(w1_ref[...], x_ref[...], preferred_element_type=jnp.float32)
    h = jnp.maximum(h + b1_ref[...], 0.0)                      # Conv1d(k=1) + ReLU
    # M=1 matmul as VPU multiply + sublane (XLU) reduction instead of an MXU dot:
    # keeps the mostly-empty MXU result tile off the per-step critical path.
    y = jnp.sum(w23_ref[...] * h, axis=0, keepdims=True) + b23_ref[...]
    o_ref[...] = y.astype(o_ref.dtype)


def _round_up(x, m):
    return ((x + m - 1) // m) * m


@functools.partial(jax.jit, static_argnames=("tile_n", "compute_dtype"))
def cnn_forward(x_ncl, conv_w, conv_b, fc1_w, fc1_b, fc2_w, fc2_b,
                *, tile_n=32768, compute_dtype=jnp.bfloat16):
    """x_ncl: (N, C_in, 1) float32 — PyTorch Conv1d NCL input. Returns (N, 1) f32."""
    N, C_in, L = x_ncl.shape
    assert L == 1, "module semantics (Flatten -> Linear(out_channels, 10)) require L == 1"
    C_out = conv_w.shape[0]
    H1 = fc1_w.shape[0]

    # ---- one-time glue (fuses into a single HBM pass under jit) ----
    # Feature-major: features on sublanes, batch on lanes.
    x_fm = x_ncl.reshape(N, C_in).T.astype(compute_dtype)           # (C_in, N)
    w1 = conv_w.reshape(C_out, C_in).astype(compute_dtype)          # (C_out, C_in)
    b1 = conv_b.reshape(C_out, 1).astype(jnp.float32)               # (C_out, 1)
    # Fold Linear(10)->Linear(1) (valid: no nonlinearity between them), all in f32.
    w23 = (fc2_w.astype(jnp.float32) @ fc1_w.astype(jnp.float32)).T          # (C_out, 1)
    b23 = (fc2_w.astype(jnp.float32) @ fc1_b.reshape(H1, 1).astype(jnp.float32)
           + fc2_b.reshape(1, 1).astype(jnp.float32))                        # (1, 1)

    # ---- batch (lane) tiling ----
    tile_n = max(128, _round_up(int(tile_n), 128))      # validate: multiple of 128
    if N > 128:
        # Never overshoot N by more than needed, and keep >= 2 grid steps so the
        # "parallel" axis can be sharded across both TensorCores on v7x.
        tile_n = min(tile_n, _round_up(pl.cdiv(N, 2), 128))
    else:
        tile_n = 128
    grid_n = pl.cdiv(N, tile_n)
    n_pad = grid_n * tile_n        # output sized to full tiles -> lane-dense stores
    # No jnp.pad of x: the boundary block reads out-of-bounds garbage columns that
    # are column-independent and sliced off below.

    itemsize = jnp.dtype(compute_dtype).itemsize
    cost = pl.CostEstimate(
        flops=int(2 * N * C_out * C_in + 4 * N * C_out + 2 * N),
        transcendentals=0,
        bytes_accessed=int(N * C_in * itemsize + N * 4
                           + C_out * (C_in * itemsize + 8) + 4),
    )
    vmem_est = (2 * C_in * tile_n * itemsize   # double-buffered x blocks
                + 2 * tile_n * 4               # double-buffered output blocks
                + 2 * C_out * tile_n * 4       # headroom for the (C_out, tile_n) h
                + (1 << 20))
    vmem_limit = int(min(64 << 20, max(32 << 20, vmem_est)))

    out = pl.pallas_call(
        cnn_kernel,
        out_shape=jax.ShapeDtypeStruct((1, n_pad), jnp.float32),
        grid=(grid_n,),
        in_specs=[
            pl.BlockSpec((C_in, tile_n), lambda i: (0, i)),   # x stream, pipelined
            pl.BlockSpec((C_out, C_in), lambda i: (0, 0)),    # weights: constant block,
            pl.BlockSpec((C_out, 1), lambda i: (0, 0)),       #   VMEM-resident across grid
            pl.BlockSpec((C_out, 1), lambda i: (0, 0)),
            pl.BlockSpec((1, 1), lambda i: (0, 0)),
        ],
        out_specs=pl.BlockSpec((1, tile_n), lambda i: (0, i)),
        compiler_params=pltpu.CompilerParams(
            dimension_semantics=("parallel",),                # megacore-shardable N axis
            vmem_limit_bytes=vmem_limit,
        ),
        cost_estimate=cost,
    )(x_fm, w1, b1, w23, b23)

    return out[:, :N].T                                       # (N, 1) f32


def init_params(key, in_channels, out_channels):
    """Deterministic synthetic parameters matching the PyTorch shapes."""
    ks = jax.random.split(key, 6)
    conv_w = jax.random.normal(ks[0], (out_channels, in_channels, 1), jnp.float32) * 0.1
    conv_b = jax.random.normal(ks[1], (out_channels,), jnp.float32) * 0.1
    fc1_w = jax.random.normal(ks[2], (10, out_channels), jnp.float32) * 0.1
    fc1_b = jax.random.normal(ks[3], (10,), jnp.float32) * 0.1
    fc2_w = jax.random.normal(ks[4], (1, 10), jnp.float32) * 0.1
    fc2_b = jax.random.normal(ks[5], (1,), jnp.float32) * 0.1
    return conv_w, conv_b, fc1_w, fc1_b, fc2_w, fc2_b


def reference_forward(x_ncl, conv_w, conv_b, fc1_w, fc1_b, fc2_w, fc2_b):
    """Pure-JAX reference reproducing the PyTorch forward exactly."""
    N, C_in, L = x_ncl.shape
    C_out = conv_w.shape[0]
    conv = jnp.einsum("ncl,ock->nol", x_ncl, conv_w) + conv_b[None, :, None]
    h = jnp.maximum(conv, 0.0)
    flat = h.reshape(N, C_out * L)
    h2 = flat @ fc1_w.T + fc1_b
    return h2 @ fc2_w.T + fc2_b


if __name__ == "__main__":
    key = jax.random.PRNGKey(0)
    k_x1, k_x2, k_p = jax.random.split(key, 3)

    in_channels, out_channels = 4, 8
    params = init_params(k_p, in_channels, out_channels)

    # Case 1: tiny batch (N=2, L=1) with the default bf16 stream (loose tolerance).
    x_small = jax.random.normal(k_x1, (2, in_channels, 1), jnp.float32)
    out_small = jax.block_until_ready(cnn_forward(x_small, *params))
    ref_small = reference_forward(x_small, *params)
    assert out_small.shape == (2, 1)
    assert jnp.allclose(out_small, ref_small, atol=1e-2, rtol=1e-2)

    # Case 2: N=300, f32 stream, default tile -> tile_n=256, grid=2 (megacore-friendly),
    # boundary block exercises the no-pad tail handling. Tight tolerance.
    x_big = jax.random.normal(k_x2, (300, in_channels, 1), jnp.float32)
    out_big = jax.block_until_ready(
        cnn_forward(x_big, *params, compute_dtype=jnp.float32))
    ref_big = reference_forward(x_big, *params)
    assert out_big.shape == (300, 1)
    assert jnp.allclose(out_big, ref_big, atol=1e-5, rtol=1e-5)

    # Case 3: explicit small tile -> grid=3 with a partial boundary block.
    out_big2 = jax.block_until_ready(
        cnn_forward(x_big, *params, tile_n=128, compute_dtype=jnp.float32))
    assert jnp.allclose(out_big2, ref_big, atol=1e-5, rtol=1e-5)

    # TODO(synk): in production, feed x already in feature-major (C_in, N) layout to
    # skip even the fused transpose pass; kernel is layout-ready for that.
    print("KERNEL_OK")
</pallas_src>

<mosaic_0001>
module attributes {stable_mosaic.version = 11 : i64} {
  func.func @cnn_kernel(%arg0: i32, %arg1: memref<4x128xbf16, #tpu.memory_space<vmem>>, %arg2: memref<8x4xbf16, #tpu.memory_space<vmem>>, %arg3: memref<8x1xf32, #tpu.memory_space<vmem>>, %arg4: memref<8x1xf32, #tpu.memory_space<vmem>>, %arg5: memref<1x1xf32, #tpu.memory_space<vmem>>, %arg6: memref<1x128xf32, #tpu.memory_space<vmem>>) attributes {dimension_semantics = [#tpu.dimension_semantics<parallel>], iteration_bounds = array<i64: 1>, scalar_prefetch = 0 : i64, scratch_operands = 0 : i64, tpu.core_type = #tpu.core_type<tc>, window_params = [{transform_indices = @transform_0, window_bounds = array<i64: 4, 128>}, {pipeline_mode = #tpu.pipeline_mode<synchronous>, transform_indices = @transform_1, window_bounds = array<i64: 8, 4>}, {pipeline_mode = #tpu.pipeline_mode<synchronous>, transform_indices = @transform_2, window_bounds = array<i64: 8, 1>}, {pipeline_mode = #tpu.pipeline_mode<synchronous>, transform_indices = @transform_3, window_bounds = array<i64: 8, 1>}, {pipeline_mode = #tpu.pipeline_mode<synchronous>, transform_indices = @transform_4, window_bounds = array<i64: 1, 1>}, {transform_indices = @transform_5, window_bounds = array<i64: 1, 128>}]} {
    %c0 = arith.constant 0 : index
    %c0_0 = arith.constant 0 : index
    %0 = vector.load %arg2[%c0, %c0_0] : memref<8x4xbf16, #tpu.memory_space<vmem>>, vector<8x4xbf16>
    %c0_1 = arith.constant 0 : index
    %c0_2 = arith.constant 0 : index
    %1 = vector.load %arg1[%c0_1, %c0_2] : memref<4x128xbf16, #tpu.memory_space<vmem>>, vector<4x128xbf16>
    %cst = arith.constant dense<0.000000e+00> : vector<8x128xf32>
    %2 = tpu.matmul %0, %1, %cst {dimension_numbers = #tpu.dot_dimension_numbers<[1], [0], [0], [1], [0, 0, 1, 1], [], []>} : vector<8x4xbf16>, vector<4x128xbf16>, vector<8x128xf32> -> vector<8x128xf32>
    %c0_3 = arith.constant 0 : index
    %c0_4 = arith.constant 0 : index
    %3 = vector.load %arg3[%c0_3, %c0_4] : memref<8x1xf32, #tpu.memory_space<vmem>>, vector<8x1xf32>
    %4 = vector.broadcast %3 : vector<8x1xf32> to vector<8x128xf32>
    %5 = arith.addf %2, %4 : vector<8x128xf32>
    %cst_5 = arith.constant 0.000000e+00 : f32
    %6 = vector.broadcast %cst_5 : f32 to vector<8x128xf32>
    %7 = arith.maximumf %5, %6 : vector<8x128xf32>
    %c0_6 = arith.constant 0 : index
    %c0_7 = arith.constant 0 : index
    %8 = vector.load %arg4[%c0_6, %c0_7] : memref<8x1xf32, #tpu.memory_space<vmem>>, vector<8x1xf32>
    %9 = vector.broadcast %8 : vector<8x1xf32> to vector<8x128xf32>
    %10 = arith.mulf %9, %7 : vector<8x128xf32>
    %cst_8 = arith.constant dense<0.000000e+00> : vector<128xf32>
    %11 = vector.multi_reduction <add>, %10, %cst_8 [0] : vector<8x128xf32> to vector<128xf32>
    %12 = vector.shape_cast %11 : vector<128xf32> to vector<1x128xf32>
    %c0_9 = arith.constant 0 : index
    %c0_10 = arith.constant 0 : index
    %13 = vector.load %arg5[%c0_9, %c0_10] : memref<1x1xf32, #tpu.memory_space<vmem>>, vector<1x1xf32>
    %14 = vector.broadcast %13 : vector<1x1xf32> to vector<1x128xf32>
    %15 = arith.addf %12, %14 : vector<1x128xf32>
    %c0_11 = arith.constant 0 : index
    %c0_12 = arith.constant 0 : index
    %16 = vector.load %arg6[%c0_11, %c0_12] : memref<1x128xf32, #tpu.memory_space<vmem>>, vector<1x128xf32>
    tpu.vector_store %arg6[%c0_11, %c0_12], %15 {strides = array<i32>} : memref<1x128xf32, #tpu.memory_space<vmem>>, vector<1x128xf32>,
    return
  }
  func.func @transform_0(%arg0: i32) -> (i32, i32) {
    %c0_i32 = arith.constant 0 : i32
    %c0_i32_0 = arith.constant 0 : i32
    return %c0_i32, %arg0 : i32, i32
  }
  func.func @transform_1(%arg0: i32) -> (i32, i32) {
    %c0_i32 = arith.constant 0 : i32
    %c0_i32_0 = arith.constant 0 : i32
    %c0_i32_1 = arith.constant 0 : i32
    return %c0_i32, %c0_i32_0 : i32, i32
  }
  func.func @transform_2(%arg0: i32) -> (i32, i32) {
    %c0_i32 = arith.constant 0 : i32
    %c0_i32_0 = arith.constant 0 : i32
    %c0_i32_1 = arith.constant 0 : i32
    return %c0_i32, %c0_i32_0 : i32, i32
  }
  func.func @transform_3(%arg0: i32) -> (i32, i32) {
    %c0_i32 = arith.constant 0 : i32
    %c0_i32_0 = arith.constant 0 : i32
    %c0_i32_1 = arith.constant 0 : i32
    return %c0_i32, %c0_i32_0 : i32, i32
  }
  func.func @transform_4(%arg0: i32) -> (i32, i32) {
    %c0_i32 = arith.constant 0 : i32
    %c0_i32_0 = arith.constant 0 : i32
    %c0_i32_1 = arith.constant 0 : i32
    return %c0_i32, %c0_i32_0 : i32, i32
  }
  func.func @transform_5(%arg0: i32) -> (i32, i32) {
    %c0_i32 = arith.constant 0 : i32
    %c0_i32_0 = arith.constant 0 : i32
    return %c0_i32, %arg0 : i32, i32
  }
}

</mosaic_0001>

<bundles_post_ra>
// kernel: cnn_forward.1
= control target key start
LH: loop header
LB: loop body
LE: loop exit
PB: predicated region body
PF: predicated region fallthrough
CT: control target
= control target key end

     0   :  { %vm35_vm0 = vcmask 1041408   ;;  %v123_v0 = vmov 0.0   ;;  %vm124_vm1 = vmmov 0   ;;  %v125_v5 = vmov 0   ;;  %s174_s0 = inlined_call_operand.vmem [shape: bf16[4,2], index: 0, kind: input, shape index: {}]   ;;  %s175_s1 = inlined_call_operand.vmem [shape: bf16[8,4], index: 1, kind: input, shape index: {}]   ;;  %s176_s2 = inlined_call_operand.vmem [shape: f32[8,1], index: 2, kind: input, shape index: {}]   ;;  %s177_s4 = inlined_call_operand.<no memory space> [shape: f32[1,1], index: 4, kind: input, shape index: {}]   ;;  %s178_s3 = inlined_call_operand.vmem [shape: f32[8,1], index: 3, kind: input, shape index: {}]   ;;  %s179_s5 = inlined_call_operand.vmem [shape: f32[1,128], index: 5, kind: output, shape index: {}]  }
   0x1   :  { %112 = vmatprep.subr.bf16.mxu0 %v123_v0  ;;  %v24_v1 = vld [vmem:[%s174_s0] sm:$0x3]  ;;  %114 = vmatprep.mubr.msk.bf16.mxu0 %vm124_vm1, %v123_v0  ;;  %v10_v3 = vstv %s177_s4  ;;  %vm31_vm2 = vcmask 31744   ;;  %v99_v14 = vlaneseq }
   0x2   :  { %v25_v2 = vld [vmem:[%s176_s2] sm:$0xff]  ;;  %v37_v4 = vsel %vm35_vm0, %v24_v1, 0  ;;  %121 = vset.pattern.permute.xlu0 %v125_v5  ;;  %122 = vset.pattern.permute.xlu1 %v125_v5  ;;  %11 = vst [vmem:[#allocation2] sm:$0x1] %v10_v3 }
   0x3   :  { %113 = vmatpush3.bf16.msra.mxu0 %v37_v4  ;;  %v23_v6 = vld [vmem:[%s175_s1] sm:$0xf]  ;;  %28 = vperm.xlu0 %121, %v25_v2   ;;  %v100_v20 = vshrl.u32 %v99_v14, 7 }
   0x4   :  { %v80_v7 = vld [vmem:[%s178_s3] sm:$0xff] }
   0x5   :  { %v101_v23 = vsub.s32 0, %v100_v20 }
   0x6   :  { %115 = vmatmul.mubr.msk.bf16.vlgmr.msra.gmra.mxu0 %vm31_vm2, %v23_v6 }
   0x7   :  { %83 = vperm.xlu0 %121, %v80_v7  }
   0x9   :  { %v93_v8 = vld [vmem:[#allocation2] sm:$0x1] }
   0xa   :  { %96 = vperm.xlu1 %122, %v93_v8  }
  0x7e   :  { %v29_v9 = vpop.permute.xlu0 %28 }
  0x82   :  { %v84_v15 = vpop.permute.xlu0 %83 }
  0x85   :  { %v97_v24 = vpop.permute.xlu1 %96 }
  0x86   :  { %v102_v27 = vrot.slane %v97_v24, %v101_v23 }
  0xc6   :  { %v73_v10 = vpop.f32.mrf.mxu0 }
  0xc7   :  { %v74_v11 = vadd.f32 %v73_v10, %v29_v9 }
  0xc8   :  { %v116_v12 = vpop.f32.mrf.mxu0 }
  0xc9   :  { %v79_v13 = vmax.f32 %v74_v11, 0.0 }
  0xca   :  { %v76_v16 = vpop.f32.mrf.mxu0 }
  0xcb   :  { %v86_v17 = vmul.f32 %v84_v15, %v79_v13 }
  0xcc   :  { %v117_v18 = vpop.f32.mrf.mxu0 }
  0xcd   :  { %v87_v19 = vrot.slane %v86_v17, 4 }
  0xcf   :  { %v88_v21 = vadd.f32 %v87_v19, %v86_v17 }
  0xd1   :  { %v89_v22 = vrot.slane %v88_v21, 2 }
  0xd3   :  { %v90_v25 = vadd.f32 %v89_v22, %v88_v21 }
  0xd5   :  { %v91_v26 = vrot.slane %v90_v25, 1 }
  0xd7   :  { %v92_v28 = vadd.f32 %v91_v26, %v90_v25 }
  0xd9   :  { %v103_v29 = vadd.f32 %v102_v27, %v92_v28 }
  0xdb   :  { %104 = vst [vmem:[%s179_s5] sm:$0x1] %v103_v29 }

</bundles_post_ra>
